<compile_context>
chip_gen: v5e
topology: v5e:2x2
jax: 0.10.0
libtpu: 0.0.40
codegen_flags: <defaults>
</compile_context>

<pallas_src>
import math

import jax
import jax.numpy as jnp
from jax.experimental import pallas as pl
from jax.experimental.pallas import tpu as pltpu


def _ae_kernel(xt_ref, w1_ref, b1_ref, w2_ref, b2_ref,
               w3_ref, b3_ref, w4_ref, b4_ref,
               enc_ref, dec_ref):
    """Fused encoder+decoder MLP in feature-major (transposed) orientation.

    encoder: Linear(D,16) -> ReLU -> Linear(16,L)
    decoder: Linear(L,16) -> ReLU -> Linear(16,D)

    All tensors have the batch tile TB on the lane axis:
      xt:(D,TB)  h1:(16,TB)  enc:(L,TB)  h2:(16,TB)  dec:(D,TB)
    Matmuls hit the MXU with f32 accumulation; bias add / ReLU on the VPU.
    """
    xt = xt_ref[...]                                                    # (D, TB)

    h1 = jnp.dot(w1_ref[...], xt, preferred_element_type=jnp.float32)
    h1 = jnp.maximum(h1 + b1_ref[...], 0.0)                             # (16, TB)

    enc = jnp.dot(w2_ref[...], h1, preferred_element_type=jnp.float32)
    enc = enc + b2_ref[...]                                             # (L, TB)

    h2 = jnp.dot(w3_ref[...], enc, preferred_element_type=jnp.float32)
    h2 = jnp.maximum(h2 + b3_ref[...], 0.0)                             # (16, TB)

    dec = jnp.dot(w4_ref[...], h2, preferred_element_type=jnp.float32)
    dec = dec + b4_ref[...]                                             # (D, TB)

    enc_ref[...] = enc.astype(enc_ref.dtype)
    dec_ref[...] = dec.astype(dec_ref.dtype)


# Max batch rows per grid step.  Per-step VMEM (double-buffered):
#   2*(D + D + L)*TB*4B  ~=  2 * 68 * 8192 * 4B  ~ 4.5 MiB  -> fits the default
# scoped VMEM on v5e/v6e/v7x, no explicit vmem_limit_bytes needed.
_TB_MAX = 8192


def _round_up(n, m):
    return ((n + m - 1) // m) * m


@jax.jit
def transaction_autoencoder(x, params):
    """Runs the fused autoencoder kernel.

    x: (B, D) float32, PyTorch row-major layout.
    Returns (encoded (B, L), decoded (B, D)), matching the nn.Module forward.
    The kernel itself works feature-major (batch on lanes); this wrapper
    transposes at the boundary to keep the PyTorch interface.  In a real
    pipeline the data would ideally be stored feature-major already.
    """
    w1, b1, w2, b2, w3, b3, w4, b4 = params
    B, D = x.shape
    L = w2.shape[0]

    # Batch sits on the lane axis inside the kernel -> tile must be a multiple
    # of 128; pad the batch up to a whole number of tiles.
    TB = min(_TB_MAX, _round_up(B, 128))
    B_pad = _round_up(B, TB)

    xt = jnp.pad(x.T, ((0, 0), (0, B_pad - B)))                         # (D, B_pad)

    grid = (B_pad // TB,)
    batch_spec = lambda rows: pl.BlockSpec((rows, TB), lambda i: (0, i))
    const_spec = lambda a: pl.BlockSpec(a.shape, lambda i: (0, 0))

    flops = 2 * B_pad * (D * 16 + 16 * L + L * 16 + 16 * D)
    bytes_accessed = 4 * (B_pad * (2 * D + L)
                          + w1.size + w2.size + w3.size + w4.size
                          + b1.size + b2.size + b3.size + b4.size)

    enc_t, dec_t = pl.pallas_call(
        _ae_kernel,
        out_shape=(
            jax.ShapeDtypeStruct((L, B_pad), jnp.float32),
            jax.ShapeDtypeStruct((D, B_pad), jnp.float32),
        ),
        grid=grid,
        in_specs=[
            batch_spec(D),                       # x^T, tiled over batch
            const_spec(w1), const_spec(b1),      # weights/biases: VMEM-resident
            const_spec(w2), const_spec(b2),
            const_spec(w3), const_spec(b3),
            const_spec(w4), const_spec(b4),
        ],
        out_specs=(batch_spec(L), batch_spec(D)),
        compiler_params=pltpu.CompilerParams(
            dimension_semantics=("parallel",)),  # shard batch across TCs (v7x)
        cost_estimate=pl.CostEstimate(
            flops=flops, transcendentals=0, bytes_accessed=bytes_accessed),
    )(xt, w1, b1, w2, b2, w3, b3, w4, b4)

    enc = enc_t[:, :B].T                                                # (B, L)
    dec = dec_t[:, :B].T                                                # (B, D)
    return enc, dec


def init_params(key, input_dim, latent_dim=4):
    """Deterministic init mimicking PyTorch Linear default U(-1/sqrt(fan_in), +).

    Weights stored PyTorch-native as (out_features, in_features);
    biases as column vectors (out_features, 1) for the feature-major kernel.
    """
    dims = [(16, input_dim), (latent_dim, 16), (16, latent_dim), (input_dim, 16)]
    params = []
    for fan_out, fan_in in dims:
        key, kw, kb = jax.random.split(key, 3)
        bound = 1.0 / math.sqrt(fan_in)
        w = jax.random.uniform(kw, (fan_out, fan_in), jnp.float32, -bound, bound)
        b = jax.random.uniform(kb, (fan_out, 1), jnp.float32, -bound, bound)
        params += [w, b]
    return tuple(params)


def _reference(x, params):
    """Plain-JAX reference of the PyTorch forward (row-major)."""
    w1, b1, w2, b2, w3, b3, w4, b4 = params
    h1 = jnp.maximum(x @ w1.T + b1.T, 0.0)
    enc = h1 @ w2.T + b2.T
    h2 = jnp.maximum(enc @ w3.T + b3.T, 0.0)
    dec = h2 @ w4.T + b4.T
    return enc, dec


if __name__ == "__main__":
    key = jax.random.PRNGKey(0)
    batch, input_dim, latent_dim = 8, 32, 4

    key, kx = jax.random.split(key)
    x = jax.random.normal(kx, (batch, input_dim), jnp.float32)
    params = init_params(key, input_dim, latent_dim)

    enc, dec = transaction_autoencoder(x, params)
    jax.block_until_ready((enc, dec))

    # Sanity check against the pure-JAX reference.
    enc_ref, dec_ref = _reference(x, params)
    assert enc.shape == (batch, latent_dim) and dec.shape == (batch, input_dim)
    assert jnp.allclose(enc, enc_ref, atol=1e-5, rtol=1e-5)
    assert jnp.allclose(dec, dec_ref, atol=1e-5, rtol=1e-5)

    print("KERNEL_OK")
</pallas_src>

<mosaic_0001>
module attributes {stable_mosaic.version = 11 : i64} {
  func.func @_ae_kernel(%arg0: i32, %arg1: memref<32x128xf32, #tpu.memory_space<vmem>>, %arg2: memref<16x32xf32, #tpu.memory_space<vmem>>, %arg3: memref<16x1xf32, #tpu.memory_space<vmem>>, %arg4: memref<4x16xf32, #tpu.memory_space<vmem>>, %arg5: memref<4x1xf32, #tpu.memory_space<vmem>>, %arg6: memref<16x4xf32, #tpu.memory_space<vmem>>, %arg7: memref<16x1xf32, #tpu.memory_space<vmem>>, %arg8: memref<32x16xf32, #tpu.memory_space<vmem>>, %arg9: memref<32x1xf32, #tpu.memory_space<vmem>>, %arg10: memref<4x128xf32, #tpu.memory_space<vmem>>, %arg11: memref<32x128xf32, #tpu.memory_space<vmem>>) attributes {dimension_semantics = [#tpu.dimension_semantics<parallel>], iteration_bounds = array<i64: 1>, scalar_prefetch = 0 : i64, scratch_operands = 0 : i64, tpu.core_type = #tpu.core_type<tc>, window_params = [{transform_indices = @transform_0, window_bounds = array<i64: 32, 128>}, {pipeline_mode = #tpu.pipeline_mode<synchronous>, transform_indices = @transform_1, window_bounds = array<i64: 16, 32>}, {pipeline_mode = #tpu.pipeline_mode<synchronous>, transform_indices = @transform_2, window_bounds = array<i64: 16, 1>}, {pipeline_mode = #tpu.pipeline_mode<synchronous>, transform_indices = @transform_3, window_bounds = array<i64: 4, 16>}, {pipeline_mode = #tpu.pipeline_mode<synchronous>, transform_indices = @transform_4, window_bounds = array<i64: 4, 1>}, {pipeline_mode = #tpu.pipeline_mode<synchronous>, transform_indices = @transform_5, window_bounds = array<i64: 16, 4>}, {pipeline_mode = #tpu.pipeline_mode<synchronous>, transform_indices = @transform_6, window_bounds = array<i64: 16, 1>}, {pipeline_mode = #tpu.pipeline_mode<synchronous>, transform_indices = @transform_7, window_bounds = array<i64: 32, 16>}, {pipeline_mode = #tpu.pipeline_mode<synchronous>, transform_indices = @transform_8, window_bounds = array<i64: 32, 1>}, {transform_indices = @transform_9, window_bounds = array<i64: 4, 128>}, {transform_indices = @transform_10, window_bounds = array<i64: 32, 128>}]} {
    %c0 = arith.constant 0 : index
    %c0_0 = arith.constant 0 : index
    %0 = vector.load %arg1[%c0, %c0_0] : memref<32x128xf32, #tpu.memory_space<vmem>>, vector<32x128xf32>
    %c0_1 = arith.constant 0 : index
    %c0_2 = arith.constant 0 : index
    %1 = vector.load %arg2[%c0_1, %c0_2] : memref<16x32xf32, #tpu.memory_space<vmem>>, vector<16x32xf32>
    %cst = arith.constant dense<0.000000e+00> : vector<16x128xf32>
    %2 = tpu.matmul %1, %0, %cst {dimension_numbers = #tpu.dot_dimension_numbers<[1], [0], [0], [1], [0, 0, 1, 1], [], []>} : vector<16x32xf32>, vector<32x128xf32>, vector<16x128xf32> -> vector<16x128xf32>
    %c0_3 = arith.constant 0 : index
    %c0_4 = arith.constant 0 : index
    %3 = vector.load %arg3[%c0_3, %c0_4] : memref<16x1xf32, #tpu.memory_space<vmem>>, vector<16x1xf32>
    %4 = vector.broadcast %3 : vector<16x1xf32> to vector<16x128xf32>
    %5 = arith.addf %2, %4 : vector<16x128xf32>
    %cst_5 = arith.constant 0.000000e+00 : f32
    %6 = vector.broadcast %cst_5 : f32 to vector<16x128xf32>
    %7 = arith.maximumf %5, %6 : vector<16x128xf32>
    %c0_6 = arith.constant 0 : index
    %c0_7 = arith.constant 0 : index
    %8 = vector.load %arg4[%c0_6, %c0_7] : memref<4x16xf32, #tpu.memory_space<vmem>>, vector<4x16xf32>
    %cst_8 = arith.constant dense<0.000000e+00> : vector<4x128xf32>
    %9 = tpu.matmul %8, %7, %cst_8 {dimension_numbers = #tpu.dot_dimension_numbers<[1], [0], [0], [1], [0, 0, 1, 1], [], []>} : vector<4x16xf32>, vector<16x128xf32>, vector<4x128xf32> -> vector<4x128xf32>
    %c0_9 = arith.constant 0 : index
    %c0_10 = arith.constant 0 : index
    %10 = vector.load %arg5[%c0_9, %c0_10] : memref<4x1xf32, #tpu.memory_space<vmem>>, vector<4x1xf32>
    %11 = vector.broadcast %10 : vector<4x1xf32> to vector<4x128xf32>
    %12 = arith.addf %9, %11 : vector<4x128xf32>
    %c0_11 = arith.constant 0 : index
    %c0_12 = arith.constant 0 : index
    %13 = vector.load %arg6[%c0_11, %c0_12] : memref<16x4xf32, #tpu.memory_space<vmem>>, vector<16x4xf32>
    %cst_13 = arith.constant dense<0.000000e+00> : vector<16x128xf32>
    %14 = tpu.matmul %13, %12, %cst_13 {dimension_numbers = #tpu.dot_dimension_numbers<[1], [0], [0], [1], [0, 0, 1, 1], [], []>} : vector<16x4xf32>, vector<4x128xf32>, vector<16x128xf32> -> vector<16x128xf32>
    %c0_14 = arith.constant 0 : index
    %c0_15 = arith.constant 0 : index
    %15 = vector.load %arg7[%c0_14, %c0_15] : memref<16x1xf32, #tpu.memory_space<vmem>>, vector<16x1xf32>
    %16 = vector.broadcast %15 : vector<16x1xf32> to vector<16x128xf32>
    %17 = arith.addf %14, %16 : vector<16x128xf32>
    %cst_16 = arith.constant 0.000000e+00 : f32
    %18 = vector.broadcast %cst_16 : f32 to vector<16x128xf32>
    %19 = arith.maximumf %17, %18 : vector<16x128xf32>
    %c0_17 = arith.constant 0 : index
    %c0_18 = arith.constant 0 : index
    %20 = vector.load %arg8[%c0_17, %c0_18] : memref<32x16xf32, #tpu.memory_space<vmem>>, vector<32x16xf32>
    %cst_19 = arith.constant dense<0.000000e+00> : vector<32x128xf32>
    %21 = tpu.matmul %20, %19, %cst_19 {dimension_numbers = #tpu.dot_dimension_numbers<[1], [0], [0], [1], [0, 0, 1, 1], [], []>} : vector<32x16xf32>, vector<16x128xf32>, vector<32x128xf32> -> vector<32x128xf32>
    %c0_20 = arith.constant 0 : index
    %c0_21 = arith.constant 0 : index
    %22 = vector.load %arg9[%c0_20, %c0_21] : memref<32x1xf32, #tpu.memory_space<vmem>>, vector<32x1xf32>
    %23 = vector.broadcast %22 : vector<32x1xf32> to vector<32x128xf32>
    %24 = arith.addf %21, %23 : vector<32x128xf32>
    %c0_22 = arith.constant 0 : index
    %c0_23 = arith.constant 0 : index
    %25 = vector.load %arg10[%c0_22, %c0_23] : memref<4x128xf32, #tpu.memory_space<vmem>>, vector<4x128xf32>
    tpu.vector_store %arg10[%c0_22, %c0_23], %12 {strides = array<i32>} : memref<4x128xf32, #tpu.memory_space<vmem>>, vector<4x128xf32>,
    %c0_24 = arith.constant 0 : index
    %c0_25 = arith.constant 0 : index
    %26 = vector.load %arg11[%c0_24, %c0_25] : memref<32x128xf32, #tpu.memory_space<vmem>>, vector<32x128xf32>
    tpu.vector_store %arg11[%c0_24, %c0_25], %24 {strides = array<i32>} : memref<32x128xf32, #tpu.memory_space<vmem>>, vector<32x128xf32>,
    return
  }
  func.func @transform_0(%arg0: i32) -> (i32, i32) {
    %c0_i32 = arith.constant 0 : i32
    %c0_i32_0 = arith.constant 0 : i32
    return %c0_i32, %arg0 : i32, i32
  }
  func.func @transform_1(%arg0: i32) -> (i32, i32) {
    %c0_i32 = arith.constant 0 : i32
    %c0_i32_0 = arith.constant 0 : i32
    %c0_i32_1 = arith.constant 0 : i32
    return %c0_i32, %c0_i32_0 : i32, i32
  }
  func.func @transform_2(%arg0: i32) -> (i32, i32) {
    %c0_i32 = arith.constant 0 : i32
    %c0_i32_0 = arith.constant 0 : i32
    %c0_i32_1 = arith.constant 0 : i32
    return %c0_i32, %c0_i32_0 : i32, i32
  }
  func.func @transform_3(%arg0: i32) -> (i32, i32) {
    %c0_i32 = arith.constant 0 : i32
    %c0_i32_0 = arith.constant 0 : i32
    %c0_i32_1 = arith.constant 0 : i32
    return %c0_i32, %c0_i32_0 : i32, i32
  }
  func.func @transform_4(%arg0: i32) -> (i32, i32) {
    %c0_i32 = arith.constant 0 : i32
    %c0_i32_0 = arith.constant 0 : i32
    %c0_i32_1 = arith.constant 0 : i32
    return %c0_i32, %c0_i32_0 : i32, i32
  }
  func.func @transform_5(%arg0: i32) -> (i32, i32) {
    %c0_i32 = arith.constant 0 : i32
    %c0_i32_0 = arith.constant 0 : i32
    %c0_i32_1 = arith.constant 0 : i32
    return %c0_i32, %c0_i32_0 : i32, i32
  }
  func.func @transform_6(%arg0: i32) -> (i32, i32) {
    %c0_i32 = arith.constant 0 : i32
    %c0_i32_0 = arith.constant 0 : i32
    %c0_i32_1 = arith.constant 0 : i32
    return %c0_i32, %c0_i32_0 : i32, i32
  }
  func.func @transform_7(%arg0: i32) -> (i32, i32) {
    %c0_i32 = arith.constant 0 : i32
    %c0_i32_0 = arith.constant 0 : i32
    %c0_i32_1 = arith.constant 0 : i32
    return %c0_i32, %c0_i32_0 : i32, i32
  }
  func.func @transform_8(%arg0: i32) -> (i32, i32) {
    %c0_i32 = arith.constant 0 : i32
    %c0_i32_0 = arith.constant 0 : i32
    %c0_i32_1 = arith.constant 0 : i32
    return %c0_i32, %c0_i32_0 : i32, i32
  }
  func.func @transform_9(%arg0: i32) -> (i32, i32) {
    %c0_i32 = arith.constant 0 : i32
    %c0_i32_0 = arith.constant 0 : i32
    return %c0_i32, %arg0 : i32, i32
  }
  func.func @transform_10(%arg0: i32) -> (i32, i32) {
    %c0_i32 = arith.constant 0 : i32
    %c0_i32_0 = arith.constant 0 : i32
    return %c0_i32, %arg0 : i32, i32
  }
}

</mosaic_0001>

<bundles_post_ra>
// kernel: transaction_autoencoder.1
= control target key start
LH: loop header
LB: loop body
LE: loop exit
PB: predicated region body
PF: predicated region fallthrough
CT: control target
= control target key end

     0   :  { %v263_v2 = vmov 0   ;;  %vm52_vm0 = vcmask 261120   ;;  %vm91_vm1 = vcmask 130048   ;;  %vm136_vm2 = vcmask 1043456   ;;  %s405_s0 = inlined_call_operand.vmem [shape: f32[32,128], index: 0, kind: input, shape index: {}]   ;;  %s406_s2 = inlined_call_operand.vmem [shape: f32[16,1], index: 2, kind: input, shape index: {}]   ;;  %s407_s1 = inlined_call_operand.vmem [shape: f32[16,32], index: 1, kind: input, shape index: {}]   ;;  %s408_s8 = inlined_call_operand.vmem [shape: f32[32,1], index: 8, kind: input, shape index: {}]   ;;  %s409_s4 = inlined_call_operand.vmem [shape: f32[4,1], index: 4, kind: input, shape index: {}]   ;;  %s410_s6 = inlined_call_operand.vmem [shape: f32[16,1], index: 6, kind: input, shape index: {}]   ;;  %s411_s3 = inlined_call_operand.vmem [shape: f32[4,16], index: 3, kind: input, shape index: {}]   ;;  %s412_s5 = inlined_call_operand.vmem [shape: f32[16,4], index: 5, kind: input, shape index: {}]   ;;  %s413_s9 = inlined_call_operand.vmem [shape: f32[4,128], index: 9, kind: output, shape index: {0}]   ;;  %s414_s7 = inlined_call_operand.vmem [shape: f32[32,16], index: 7, kind: input, shape index: {}]   ;;  %s415_s10 = inlined_call_operand.vmem [shape: f32[32,128], index: 10, kind: output, shape index: {1}]  }
   0x1   :  { %v37_v0 = vld [vmem:[%s405_s0 + $0x18] sm:$0xff]  ;;  %v36_v1 = vld [vmem:[%s405_s0 + $0x10] sm:$0xff]  ;;  %260 = vset.pattern.permute.xlu0 %v263_v2  ;;  %v41_v3 = vld [vmem:[%s406_s2 + $0x8] sm:$0xff]  ;;  %261 = vset.pattern.permute.xlu1 %v263_v2  ;;  %vm129_vm3 = vcmask 31744  }
   0x2   :  { %71 = vmatpush.msra.mxu0 %v37_v0  ;;  %49 = vperm.xlu0 %260, %v41_v3   ;;  %v35_v4 = vld [vmem:[%s405_s0 + $0x8] sm:$0xff]  ;;  %v34_v5 = vld [vmem:[%s405_s0] sm:$0xff]  ;;  %v171_v12 = vld [vmem:[%s408_s8 + $0x10] sm:$0xff] }
   0x3   :  { %262 = vset.pattern.permute.xlu2 %v263_v2  ;;  %v38_v6 = vld [vmem:[%s407_s1] sm:$0xff]  ;;  %v39_v8 = vld [vmem:[%s407_s1 + $0x8] sm:$0xff]  ;;  %v172_v24 = vld [vmem:[%s408_s8 + $0x18] sm:$0xff] }
   0x4   :  { %72 = vmatpush.msra.mxu0 %v36_v1  ;;  %v40_v7 = vld [vmem:[%s406_s2] sm:$0xff]  ;;  %v170_v9 = vld [vmem:[%s408_s8 + $0x8] sm:$0xff]  ;;  %v167_v40 = vld [vmem:[%s414_s7 + $0x10] sm:$0xff] }
   0x5   :  { %v85_v10 = vld [vmem:[%s409_s4] sm:$0xf]  ;;  %v118_v11 = vld [vmem:[%s410_s6 + $0x8] sm:$0xff]  ;;  %v168_v41 = vld [vmem:[%s414_s7 + $0x18] sm:$0xff] }
   0x6   :  { %73 = vmatpush.msra.mxu0 %v35_v4  ;;  %88 = vperm.xlu1 %261, %v85_v10   ;;  %v84_v21 = vld [vmem:[%s411_s3] sm:$0xf]  ;;  %v116_v29 = vld [vmem:[%s412_s5 + $0x8] sm:$0xff] }
   0x7   :  { %v117_v22 = vld [vmem:[%s410_s6] sm:$0xff]  ;;  %v166_v39 = vld [vmem:[%s414_s7 + $0x8] sm:$0xff] }
   0x8   :  { %74 = vmatpush.msra.mxu0 %v34_v5  ;;  %121 = vperm.xlu2 %262, %v117_v22   ;;  %v169_v23 = vld [vmem:[%s408_s8] sm:$0xff] }
   0x9   :  { %247 = vmatmul.msk.f32.vlgmr.msra.gmra.mxu0 %vm52_vm0, %v38_v6  ;;  %v115_v28 = vld [vmem:[%s412_s5] sm:$0xff] }
   0xa   :  { %44 = vperm.xlu0 %260, %v40_v7   ;;  %v165_v38 = vld [vmem:[%s414_s7] sm:$0xff] }
   0xe   :  { %126 = vperm.xlu1 %261, %v118_v11  }
  0x10   :  { %175 = vperm.xlu2 %262, %v169_v23  }
  0x11   :  { %248 = vmatmul.msk.f32.gmra.mxu0 %vm52_vm0, %v39_v8 }
  0x12   :  { %180 = vperm.xlu0 %260, %v170_v9  }
  0x16   :  { %185 = vperm.xlu1 %261, %v171_v12  }
  0x18   :  { %190 = vperm.xlu2 %262, %v172_v24  }
  0x62   :  { %v122_v32 = vpop.permute.xlu2 %121 }
  0x6a   :  { %v176_v42 = vpop.permute.xlu2 %175 }
  0x72   :  { %v191_v51 = vpop.permute.xlu2 %190 }
  0x74   :  { %v50_v13 = vpop.permute.xlu0 %49 }
  0x78   :  { %v89_v25 = vpop.permute.xlu1 %88 }
  0x7c   :  { %v45_v15 = vpop.permute.xlu0 %44 }
  0x80   :  { %v127_v31 = vpop.permute.xlu1 %126 }
  0x84   :  { %v181_v45 = vpop.permute.xlu0 %180 }
  0x86   :  { %v76_v14 = vpop.f32.mrf.mxu0 }
  0x87   :  { %v77_v17 = vadd.f32 %v76_v14, %v45_v15 }
  0x88   :  { %v186_v48 = vpop.permute.xlu1 %185 }
  0x89   :  { %v82_v20 = vmax.f32 %v77_v17, 0.0 }
  0x8e   :  { %v79_v16 = vpop.f32.mrf.mxu0 }
  0x8f   :  { %v80_v18 = vadd.f32 %v79_v16, %v50_v13 }
  0x91   :  { %v83_v19 = vmax.f32 %v80_v18, 0.0 }
  0x93   :  { %109 = vmatpush.msra.mxu1 %v83_v19 }
  0x95   :  { %110 = vmatpush.msra.mxu1 %v82_v20 }
  0x96   :  { %249 = vmatmul.msk.f32.vlgmr.msra.gmra.mxu1 %vm91_vm1, %v84_v21 }
 0x113   :  { %v112_v26 = vpop.f32.mrf.mxu1 }
 0x114   :  { %v113_v27 = vadd.f32 %v112_v26, %v89_v25 }
 0x116   :  { %234 = vst [vmem:[%s413_s9] sm:$0xf] %v113_v27  ;;  %250 = vmatpush.msk.msra.mxu2 %vm136_vm2, %v113_v27 }
 0x117   :  { %251 = vmatmul.msk.f32.vlgmr.msra.gmra.mxu2 %vm129_vm3, %v115_v28 }
 0x11f   :  { %252 = vmatmul.msk.f32.gmra.mxu2 %vm129_vm3, %v116_v29 }
 0x19a   :  { %v157_v30 = vpop.f32.mrf.mxu2 }
 0x19b   :  { %v158_v34 = vadd.f32 %v157_v30, %v122_v32 }
 0x19d   :  { %v163_v37 = vmax.f32 %v158_v34, 0.0 }
 0x1a2   :  { %v160_v33 = vpop.f32.mrf.mxu2 }
 0x1a3   :  { %v161_v35 = vadd.f32 %v160_v33, %v127_v31 }
 0x1a5   :  { %v164_v36 = vmax.f32 %v161_v35, 0.0 }
 0x1a7   :  { %219 = vmatpush.msrb.mxu1 %v164_v36  ;;  %257 = vmatpush.msra.mxu3 %v164_v36 }
 0x1a9   :  { %220 = vmatpush.msrb.mxu1 %v163_v37  ;;  %258 = vmatpush.msra.mxu3 %v163_v37 }
 0x1aa   :  { %253 = vmatmul.msk.f32.vlgmr.msrb.gmra.mxu1 %vm91_vm1, %v165_v38  ;;  %254 = vmatmul.msk.f32.vlgmr.msra.gmra.mxu3 %vm91_vm1, %v166_v39 }
 0x1b2   :  { %255 = vmatmul.msk.f32.gmra.mxu3 %vm91_vm1, %v167_v40 }
 0x1ba   :  { %256 = vmatmul.msk.f32.gmra.mxu3 %vm91_vm1, %v168_v41 }
 0x227   :  { %v222_v43 = vpop.f32.mrf.mxu1 }
 0x228   :  { %v223_v44 = vadd.f32 %v222_v43, %v176_v42 }
 0x22a   :  { %235 = vst [vmem:[%s415_s10] sm:$0xff] %v223_v44 }
 0x22d   :  { %v225_v46 = vpop.f32.mrf.mxu3 }
 0x22e   :  { %v226_v47 = vadd.f32 %v225_v46, %v181_v45 }
 0x230   :  { %236 = vst [vmem:[%s415_s10 + $0x8] sm:$0xff] %v226_v47 }
 0x235   :  { %v228_v49 = vpop.f32.mrf.mxu3 }
 0x236   :  { %v229_v50 = vadd.f32 %v228_v49, %v186_v48 }
 0x238   :  { %237 = vst [vmem:[%s415_s10 + $0x10] sm:$0xff] %v229_v50 }
 0x23d   :  { %v231_v52 = vpop.f32.mrf.mxu3 }
 0x23e   :  { %v232_v53 = vadd.f32 %v231_v52, %v191_v51 }
 0x240   :  { %238 = vst [vmem:[%s415_s10 + $0x18] sm:$0xff] %v232_v53 }

</bundles_post_ra>
